<compile_context>
chip_gen: v6e
topology: v6e:2x2x1
jax: 0.10.0
libtpu: 0.0.40
codegen_flags: <defaults>
</compile_context>

<pallas_src>
import functools

import jax
import jax.numpy as jnp
from jax.experimental import pallas as pl
from jax.experimental.pallas import tpu as pltpu


# ----------------------------------------------------------------------------
# Kernel
# ----------------------------------------------------------------------------
def _linear_kernel(x_ref, w_ref, b_ref, o_ref):
    # MXU matmul with f32 accumulation; bias broadcast-add on the VPU.
    acc = jnp.dot(x_ref[...], w_ref[...], preferred_element_type=jnp.float32)
    o_ref[...] = (acc + b_ref[...].astype(jnp.float32)).astype(o_ref.dtype)


# ----------------------------------------------------------------------------
# Planning helpers (all static / trace-time Python ints)
# ----------------------------------------------------------------------------
def _round_up(x, mult):
    return ((x + mult - 1) // mult) * mult


def _cdiv(a, b):
    return (a + b - 1) // b


@functools.lru_cache(maxsize=None)
def _vmem_capacity_bytes():
    try:
        return int(pltpu.get_tpu_info().vmem_capacity_bytes)
    except Exception:
        return 64 << 20  # conservative: v7x per-TensorCore VMEM


def _budgets(vmem_cap_bytes):
    """(tile_budget, vmem_limit_bytes) chosen per TPU generation."""
    if vmem_cap_bytes >= (96 << 20):      # v5e / v6e: 128 MiB physical VMEM
        return 56 << 20, 100 << 20
    return 26 << 20, 48 << 20             # v7x: 64 MiB per TensorCore


def _plan(m, in_dim, out_pad, x_bytes, w_bytes, b_bytes, tile_budget):
    """Pick (tm, tn, grid_m, grid_n, weight_resident)."""
    sublane = max(8, 32 // x_bytes)        # 8 f32, 16 bf16, 32 int8/fp8

    # N tiling: keep the whole weight resident (single-buffered) when it uses
    # at most ~half the budget; otherwise stream double-buffered (in_dim, tn).
    w_full = in_dim * out_pad * w_bytes + out_pad * b_bytes
    if w_full <= tile_budget // 2:
        tn, w_buffers = out_pad, 1
    else:
        tn = (tile_budget // 2) // max(2 * in_dim * w_bytes, 1)
        tn = min(out_pad, max(128, (tn // 128) * 128))
        w_buffers = 2

    fixed = w_buffers * (in_dim * tn * w_bytes + tn * b_bytes)
    per_row = 2 * (in_dim + tn) * x_bytes            # double-buffered x / out
    avail = max(tile_budget - fixed, per_row * sublane)
    tm = min(avail // per_row, 1024)                 # amortize ~0.35us/step
    tm = max(sublane, (tm // sublane) * sublane)

    m_rounded = _round_up(max(m, 1), sublane)
    tm = min(tm, m_rounded)
    # Give both v7x TensorCores a row tile (costs one ~0.35us step elsewhere).
    if tm >= m_rounded and m_rounded > sublane:
        tm = _round_up(_cdiv(m_rounded, 2), sublane)

    return tm, tn, _cdiv(m, tm), _cdiv(out_pad, tn), (w_buffers == 1)


# ----------------------------------------------------------------------------
# One-time parameter preparation (call once, cache the result)
# ----------------------------------------------------------------------------
def prepare_classification_head_params(weight, bias, param_dtype=None):
    """weight: [out_dim, in_dim] (PyTorch layout), bias: [out_dim].

    Returns (weight_t_padded [in_dim, out_pad], bias_padded [out_pad], out_dim)
    with out_pad a multiple of 128 so output stores are full-lane.  Do NOT call
    per forward pass -- padding copies the weight in HBM."""
    out_dim, _ = weight.shape
    if param_dtype is not None:
        weight = weight.astype(param_dtype)   # e.g. bf16 to halve weight traffic
    w_t = jnp.asarray(weight).T
    bias = jnp.asarray(bias)
    out_pad = _round_up(out_dim, 128)
    if out_pad != out_dim:
        w_t = jnp.pad(w_t, ((0, 0), (0, out_pad - out_dim)))
        bias = jnp.pad(bias, (0, out_pad - out_dim))
    return w_t, bias, out_dim


# ----------------------------------------------------------------------------
# Forward pass
# ----------------------------------------------------------------------------
@functools.partial(jax.jit, static_argnames=("out_dim", "interpret"))
def classification_head(x, weight_t_padded, bias_padded, out_dim, interpret=False):
    """y = x @ W^T + b, with pre-padded params from prepare_classification_head_params."""
    in_dim = x.shape[-1]
    out_pad = weight_t_padded.shape[-1]
    lead_shape = x.shape[:-1]

    x2d = x.reshape(-1, in_dim)
    m = x2d.shape[0]
    b2d = bias_padded.reshape(1, out_pad)

    x_bytes = jnp.dtype(x.dtype).itemsize
    w_bytes = jnp.dtype(weight_t_padded.dtype).itemsize
    b_bytes = jnp.dtype(bias_padded.dtype).itemsize

    tile_budget, vmem_limit = _budgets(_vmem_capacity_bytes())
    tm, tn, grid_m, grid_n, weight_resident = _plan(
        m, in_dim, out_pad, x_bytes, w_bytes, b_bytes, tile_budget
    )

    x_spec = pl.BlockSpec((tm, in_dim), lambda i, j: (i, 0))
    if weight_resident and grid_n == 1:
        # Weight/bias are DMA'd once and stay resident: one buffer, not two.
        w_spec = pl.BlockSpec((in_dim, tn), lambda i, j: (0, j),
                              pipeline_mode=pl.Buffered(1))
        b_spec = pl.BlockSpec((1, tn), lambda i, j: (0, j),
                              pipeline_mode=pl.Buffered(1))
    else:
        w_spec = pl.BlockSpec((in_dim, tn), lambda i, j: (0, j))
        b_spec = pl.BlockSpec((1, tn), lambda i, j: (0, j))

    cost = pl.CostEstimate(
        flops=2 * m * in_dim * out_pad,
        transcendentals=0,
        bytes_accessed=(
            m * in_dim * x_bytes
            + in_dim * out_pad * w_bytes
            + out_pad * b_bytes
            + m * out_pad * x_bytes
        ),
    )

    y2d = pl.pallas_call(
        _linear_kernel,
        out_shape=jax.ShapeDtypeStruct((m, out_pad), x.dtype),
        grid_spec=pltpu.PrefetchScalarGridSpec(
            num_scalar_prefetch=0,
            grid=(grid_m, grid_n),
            in_specs=[x_spec, w_spec, b_spec],
            out_specs=pl.BlockSpec((tm, tn), lambda i, j: (i, j)),
        ),
        compiler_params=pltpu.CompilerParams(
            dimension_semantics=("parallel", "parallel"),
            vmem_limit_bytes=vmem_limit,
        ),
        cost_estimate=cost,
        interpret=interpret,
    )(x2d, weight_t_padded, b2d)

    return y2d[:, :out_dim].reshape(*lead_shape, out_dim)


# ----------------------------------------------------------------------------
# Self-test
# ----------------------------------------------------------------------------
if __name__ == "__main__":
    input_dim = 32
    output_dim = 16
    batch, seq = 2, 8

    key = jax.random.PRNGKey(0)
    kx, kw, kb = jax.random.split(key, 3)

    # nn.Linear-style init: U(-1/sqrt(in_dim), 1/sqrt(in_dim)).
    bound = 1.0 / jnp.sqrt(jnp.float32(input_dim))
    weight = jax.random.uniform(
        kw, (output_dim, input_dim), jnp.float32, minval=-bound, maxval=bound
    )  # PyTorch layout [out, in]
    bias = jax.random.uniform(
        kb, (output_dim,), jnp.float32, minval=-bound, maxval=bound
    )
    x = jax.random.normal(kx, (batch, seq, input_dim), jnp.float32)

    # One-time param prep (transpose + lane-dense pad), outside the hot path.
    w_t_pad, b_pad, out_dim = prepare_classification_head_params(weight, bias)

    y = classification_head(x, w_t_pad, b_pad, out_dim)
    jax.block_until_ready(y)

    # Reference check against plain JAX.
    y_ref = x @ weight.T + bias
    assert y.shape == (batch, seq, output_dim)
    assert jnp.allclose(y, y_ref, atol=1e-5, rtol=1e-5)

    print("KERNEL_OK")
</pallas_src>

<mosaic_0001>
module attributes {stable_mosaic.version = 11 : i64} {
  func.func @_linear_kernel(%arg0: i32, %arg1: i32, %arg2: memref<8x32xf32, #tpu.memory_space<vmem>>, %arg3: memref<32x128xf32, #tpu.memory_space<vmem>>, %arg4: memref<1x128xf32, #tpu.memory_space<vmem>>, %arg5: memref<8x128xf32, #tpu.memory_space<vmem>>) attributes {dimension_semantics = [#tpu.dimension_semantics<parallel>, #tpu.dimension_semantics<parallel>], iteration_bounds = array<i64: 2, 1>, scalar_prefetch = 0 : i64, scratch_operands = 0 : i64, tpu.core_type = #tpu.core_type<tc>, window_params = [{transform_indices = @transform_0, window_bounds = array<i64: 8, 32>}, {pipeline_mode = #tpu.pipeline_mode<synchronous>, transform_indices = @transform_1, window_bounds = array<i64: 32, 128>}, {pipeline_mode = #tpu.pipeline_mode<synchronous>, transform_indices = @transform_2, window_bounds = array<i64: 1, 128>}, {transform_indices = @transform_3, window_bounds = array<i64: 8, 128>}]} {
    %c0 = arith.constant 0 : index
    %c0_0 = arith.constant 0 : index
    %0 = vector.load %arg2[%c0, %c0_0] : memref<8x32xf32, #tpu.memory_space<vmem>>, vector<8x32xf32>
    %c0_1 = arith.constant 0 : index
    %c0_2 = arith.constant 0 : index
    %1 = vector.load %arg3[%c0_1, %c0_2] : memref<32x128xf32, #tpu.memory_space<vmem>>, vector<32x128xf32>
    %cst = arith.constant dense<0.000000e+00> : vector<8x128xf32>
    %2 = tpu.matmul %0, %1, %cst {dimension_numbers = #tpu.dot_dimension_numbers<[1], [0], [0], [1], [0, 0, 1, 1], [], []>} : vector<8x32xf32>, vector<32x128xf32>, vector<8x128xf32> -> vector<8x128xf32>
    %c0_3 = arith.constant 0 : index
    %c0_4 = arith.constant 0 : index
    %3 = vector.load %arg4[%c0_3, %c0_4] : memref<1x128xf32, #tpu.memory_space<vmem>>, vector<1x128xf32>
    %4 = vector.broadcast %3 : vector<1x128xf32> to vector<8x128xf32>
    %5 = arith.addf %2, %4 : vector<8x128xf32>
    %c0_5 = arith.constant 0 : index
    %c0_6 = arith.constant 0 : index
    %6 = vector.load %arg5[%c0_5, %c0_6] : memref<8x128xf32, #tpu.memory_space<vmem>>, vector<8x128xf32>
    tpu.vector_store %arg5[%c0_5, %c0_6], %5 {strides = array<i32>} : memref<8x128xf32, #tpu.memory_space<vmem>>, vector<8x128xf32>,
    return
  }
  func.func @transform_0(%arg0: i32, %arg1: i32) -> (i32, i32) {
    %c0_i32 = arith.constant 0 : i32
    %c0_i32_0 = arith.constant 0 : i32
    return %arg0, %c0_i32 : i32, i32
  }
  func.func @transform_1(%arg0: i32, %arg1: i32) -> (i32, i32) {
    %c0_i32 = arith.constant 0 : i32
    %c0_i32_0 = arith.constant 0 : i32
    return %c0_i32, %arg1 : i32, i32
  }
  func.func @transform_2(%arg0: i32, %arg1: i32) -> (i32, i32) {
    %c0_i32 = arith.constant 0 : i32
    %c0_i32_0 = arith.constant 0 : i32
    return %c0_i32, %arg1 : i32, i32
  }
  func.func @transform_3(%arg0: i32, %arg1: i32) -> (i32, i32) {
    %c0_i32 = arith.constant 0 : i32
    return %arg0, %arg1 : i32, i32
  }
}

</mosaic_0001>

<bundles_post_ra>
// kernel: classification_head.1
= control target key start
LH: loop header
LB: loop body
LE: loop exit
PB: predicated region body
PF: predicated region fallthrough
CT: control target
= control target key end

     0   :  { %8 = vsyncpa [#allocation3], 0  ;;  %s798_s0 = inlined_call_operand.hbm [shape: f32[16,32], index: 0, kind: input, shape index: {}]   ;;  %s799_s1 = inlined_call_operand.hbm [shape: f32[32,128], index: 1, kind: input, shape index: {}]   ;;  %s800_s2 = inlined_call_operand.vmem [shape: f32[1,128], index: 2, kind: input, shape index: {}]   ;;  %s801_s3 = inlined_call_operand.vmem [shape: f32[16,128], index: 3, kind: output, shape index: {}]  }
   0x1   :  { %10 = vsyncpa [#allocation3 + $0x1], 0 }
   0x2   :  { %11 = vsyncpa [#allocation5], 0  ;;  %s674_s12 = smov 0   ;;  %s676_s13 = smov 0  }
   0x3   :  { %s678_s14 = smov 0   ;;  %s680_s15 = smov 0  }
   0x4   :  { %s682_s16 = smov 0   ;;  %s684_s17 = smov 0  }
   0x5 LB: > { %s436_s18 = sadd.s32 4294967295, %s646_s17   ;;  %p49_p0 = scmp.ne.s32.totalorder %s630_s13, %s626_s12  ;;  %s646_s17 = sphi %s684_s17, %s17_s17   ;;  %s642_s16 = sphi %s682_s16, %s811_s16   ;;  %s638_s15 = sphi %s680_s15, %s810_s15   ;;  %s634_s14 = sphi %s678_s14, %s809_s14   ;;  %s630_s13 = sphi %s676_s13, %s808_s13   ;;  %s626_s12 = sphi %s674_s12, %s807_s12  }
   0x6   : > { %p704_p1 = scmp.eq.s32.totalorder %s436_s18, 0  ;;  %p438_p2 = scmp.ge.s32.totalorder %s646_s17, 1 }
   0x7   : > { %p140_p3 = scmp.lt.s32.totalorder %s646_s17, 3  ;;  %s648_s22 = smov [#allocation4]  }
   0x8   : > { %p712_p4 = por %p704_p1, %p49_p0  ;;  %s154_s23 = sshll.u32 %s648_s22, 4  ;;  %s155_s23 = int_to_ptr.vmem [resolvable:$true] %s154_s23 }
   0x9   : > { %p716_p5 = pnand %p438_p2, %p140_p3  ;;  %s29_s25 = sadd.s32 1, %s642_s16 }
   0xa   : > { %s549_s26 = scalar_lea.vmem %s155_s23, 512  ;;  %p557_p12 = scmp.lt.s32.totalorder %s155_s23, %s155_s23 }
   0xb   : > { %p474_p6 = pneg %p716_p5  ;;  %p550_p9 = scmp.ne.s32.totalorder %s155_s23, %s549_s26 }
   0xc   : > { %p558_p13 = scmp.lt.s32.totalorder %s549_s26, %s549_s26 }
   0xd   : > { %p724_p7 = pnand %p474_p6, %p704_p1 }
   0xe   : > { %p559_p0 = por %p558_p13, %p557_p12 }
   0xf   : > { %p540_p8 = pneg %p724_p7 }
  0x11   : > { %p552_p10 = pnand %p550_p9, %p540_p8 }
  0x13   : > { %p553_p11 = pneg %p552_p10 }
  0x15   : > { %p560_p2 = pnand %p559_p0, %p553_p11 }
  0x17   : > { %563 = shalt.err (!%p560_p2)
}
  0x18   : > { %s649_s27 = smov 128   ;;  %s650_s28 = smov 8  }
  0x19   : > { %477 = dma.hbm_to_vmem [thread:$0]  (!%p724_p7), %s799_s1, 512, %s155_s23, [#allocation5], %s649_s27, %s649_s27, %s650_s28  }
  0x1a   : > { %p31_p3 = scmp.ge.s32.totalorder %s29_s25, 2  ;;  %s36_s4 = sadd.s32 1, %s634_s14 }
  0x1b   : > { %p43_p6 = scmp.ne.s32.totalorder %s634_s14, %s630_s13  ;;  %p44_p8 = scmp.eq.s32.totalorder %s646_s17, 0 }
  0x1c   : > { %s813_s25 = smov (%p31_p3, %s29_s25), 0  ;;  %p483_p10 = scmp.lt.s32.totalorder %s646_s17, 2 }
  0x1d   : > { %p45_p9 = por %p44_p8, %p43_p6  ;;  %s33_s5 = ssub.s32 %s642_s16, %s813_s25 }
  0x1e   : > { %s174_s6 = sand.u32 1, %s634_s14   ;;  %p34_p11 = scmp.eq.s32.totalorder %s33_s5, 0 }
  0x1f   : > { %s442_s7 = sshll.u32 %s174_s6, 3  ;;  %s443_s8 = sshll.u32 %s642_s16, 7 }
  0x20   : > { %s748_s9 = scalar_select %p34_p11, %s634_s14, %s36_s4  }
  0x21   : > { %s183_s12 = scalar_lea.hbm %s798_s0, %s443_s8  ;;  %s178_s18 = scalar_lea.vmem [#allocation2], %s442_s7 }
  0x22   : > { %s185_s22 = sshll.u32 %s178_s18, 4  ;;  %p753_p7 = pnand %p483_p10, %p45_p9  ;;  %s186_s22 = int_to_ptr.vmem [resolvable:$true] %s185_s22 }
  0x23   : > { %s175_s24 = scalar_lea.sflag [#allocation3], %s174_s6  ;;  %s577_s26 = scalar_lea.vmem %s186_s22, 128 }
  0x24   : > { %p566_p12 = pneg %p753_p7  ;;  %p578_p13 = scmp.ne.s32.totalorder %s186_s22, %s577_s26 }
  0x25   : > { %s651_s27 = smov [#allocation2]  }
  0x26   : > { %p580_p0 = pnand %p578_p13, %p566_p12  ;;  %s582_s28 = sshll.u32 %s651_s27, 4  ;;  %s583_s28 = int_to_ptr.vmem [resolvable:$false] %s582_s28 }
  0x27   : > { %s584_s29 = scalar_lea.vmem %s583_s28, 256  ;;  %p585_p3 = scmp.lt.s32.totalorder %s186_s22, %s583_s28 }
  0x28   : > { %p581_p2 = pneg %p580_p0  ;;  %p586_p6 = scmp.lt.s32.totalorder %s584_s29, %s577_s26 }
  0x2a   : > { %p587_p8 = por %p586_p6, %p585_p3 }
  0x2c   : > { %p588_p9 = pnand %p587_p8, %p581_p2 }
  0x2e   : > { %591 = shalt.err (!%p588_p9)
}
  0x2f   : > { %481 = dma.hbm_to_vmem [thread:$0]  (!%p753_p7), %s183_s12, 128, %s186_s22, %s175_s24  }
  0x30   : > { %194 = sbr.rel (%p716_p5) target bundleno = 261 (0x105), region = 32  ;;  %s196_s30 = sand.u32 (!%p716_p5), 1, %s630_s13  }
  0x31   : > { %s445_s4 = sshll.u32 (!%p716_p5), %s196_s30, 3  ;;  %s197_s5 = scalar_lea.sflag (!%p716_p5), [#allocation3], %s196_s30 }
  0x32   : > { %s200_s6 = scalar_lea.vmem (!%p716_p5), [#allocation2], %s445_s4 }
  0x35   : > { %617 = dma.done.wait (%p712_p4), %s197_s5, 128  }
  0x36   : > { %619 = vsyncadd (%p712_p4), %s197_s5, 4294967168 }
  0x37   : > { %621 = dma.done.wait (%p704_p1), [#allocation5], 512  }
  0x38   : > { %623 = vsyncadd (%p704_p1), [#allocation5], 4294966784  ;;  %v652_v0 = vmov 0.0   ;;  %vm653_vm0 = vmmov 0   ;;  %v246_v1 = vld [vmem:[#allocation4 + $0x18] sm:$0xff]  ;;  %v245_v2 = vld [vmem:[#allocation4 + $0x10] sm:$0xff] }
  0x39   : > { %457 = vmatprep.subr.mxu0 %v652_v0  ;;  %465 = vmatprep.mubr.msk.f32.mxu0 %vm653_vm0, %v652_v0  ;;  %v244_v3 = vld [vmem:[#allocation4 + $0x8] sm:$0xff]  ;;  %v243_v4 = vld [vmem:[#allocation4] sm:$0xff]  ;;  %v242_v5 = vld [vmem:[%s200_s6] sm:$0xff]  ;;  %vm254_vm1 = vcmask 261120   ;;  %p235_p1 = scmp.lt.s32.totalorder %s638_s15, 1 }
  0x3a   : > { %458 = vmatpush3.msra.mxu0 %v246_v1  ;;  %v448_v6 = vld [vmem:[%s800_s2] ss:$0 sm:$0xff] }
  0x3b   : > { %459 = vmatprep.subr.mxu0 %v652_v0  ;;  %s815_s15 = smov (!%p235_p1, %s638_s15), 1 }
  0x3c   : > { %460 = vmatpush3.msra.mxu0 %v245_v2  ;;  %s447_s19 = sshll.u32 %s815_s15, 3 }
  0x3d   : > { %461 = vmatprep.subr.mxu0 %v652_v0  ;;  %s241_s10 = scalar_lea.vmem %s801_s3, %s447_s19 }
  0x3e   : > { %462 = vmatpush3.msra.mxu0 %v244_v3 }
  0x3f   : > { %463 = vmatprep.subr.mxu0 %v652_v0 }
  0x40   : > { %464 = vmatpush3.msra.mxu0 %v243_v4 }
  0x41   : > { %466 = vmatmul.mubr.msk.f32.vlgmr.msra.gmra.mxu0 %vm254_vm1, %v242_v5 }
 0x101   : > { %v324_v7 = vpop.f32.mrf.mxu0 }
 0x102   : > { %v325_v8 = vadd.f32 %v448_v6, %v324_v7 }
 0x103   : > { %v467_v9 = vpop.f32.mrf.mxu0 }
 0x104   : > { %328 = vst [vmem:[%s241_s10] sm:$0xff] %v325_v8 }
 0x105 PF: > { %s17_s17 = sadd.s32 1, %s646_s17   ;;  %s807_s12 = smov %s630_s13 }
 0x106   : > { %p14_p4 = scmp.ge.s32.totalorder %s17_s17, 4   ;;  %s808_s13 = smov %s634_s14 }
 0x107   : > { %s809_s14 = smov %s748_s9  ;;  %s810_s15 = smov %s642_s16 }
 0x108   : > { %s811_s16 = smov %s813_s25  ;;  %16 = sbr.rel (!%p14_p4) target bundleno = 5 (0x5), region = 80 }
 0x10d   :  { %354 = vsyncpa [#allocation3], 1 }
 0x10e   :  { %356 = vsyncpa [#allocation3 + $0x1], 1 }
 0x10f   :  { %357 = vsyncpa [#allocation5], 1 }

</bundles_post_ra>
